<compile_context>
chip_gen: v7x
topology: tpu7x:2x2x1
jax: 0.10.0
libtpu: 0.0.40
codegen_flags: <defaults>
</compile_context>

<pallas_src>
import math

import jax
import jax.numpy as jnp
from jax.experimental import pallas as pl
from jax.experimental.pallas import tpu as pltpu

_HALF_LOG_2PI = 0.5 * math.log(2.0 * math.pi)


def _policy_kernel(x_ref, w1_ref, w2_ref, consts_ref, noise_ref, out_ref):
    H = w1_ref.shape[1]
    A = w2_ref.shape[1]

    # Packed constants (f32): row 0 = b1 (width H), row 1 = b2, row 2 = log_std,
    # row 3 = std = exp(log_std)  (widths A).
    b1 = consts_ref[0:1, :H]        # [1, H]
    b2 = consts_ref[1:2, :A]        # [1, A]
    log_std = consts_ref[2:3, :A]   # [1, A]
    std = consts_ref[3:4, :A]       # [1, A]

    # hidden = tanh(x @ W1 + b1)   (f32 accumulate even if x/W1 are bf16)
    h = jnp.tanh(
        jnp.dot(x_ref[...], w1_ref[...], preferred_element_type=jnp.float32) + b1
    )
    # mean = hidden @ W2 + b2
    mean = jnp.dot(h, w2_ref[...], preferred_element_type=jnp.float32) + b2

    eps = noise_ref[...]

    # action ~ Normal(mean, std), reparameterized with externally supplied eps.
    action = mean + std * eps

    # Normal(mean, std).log_prob(action); since (action - mean) / std == eps exactly:
    logprob = -0.5 * (eps * eps) - log_std - _HALF_LOG_2PI

    # Direct slice stores into the packed [TB, 2A] output tile (no concat temp).
    out_ref[:, :A] = action
    out_ref[:, A:] = logprob


def _choose_batch_tile(B, per_row_bytes, fixed_bytes, block_b):
    """Pick a batch tile: large enough to amortize per-step overhead, small
    enough to keep the double-buffered working set under ~12 MiB (v5e-safe),
    and yielding >= 2 grid steps for large B (v7x megacore)."""
    budget = 12 * 1024 * 1024
    cap = max(8, ((budget - fixed_bytes) // (2 * per_row_bytes)) // 8 * 8)
    block_b = max(8, min(block_b, cap))
    if B <= 512:
        # Overhead-dominated regardless; single full-batch step (full-dim block
        # is allowed even when B is not a multiple of 8).
        return B
    # At least 2 grid steps so both v7x TensorCores get work when the batch
    # axis is sharded via dimension_semantics=("parallel",).
    n_steps = max(2, -(-B // block_b))
    tb = -(-B // n_steps)
    tb = ((tb + 7) // 8) * 8
    return min(block_b, tb)


def gaussian_policy_forward(x, w1, b1, w2, b2, log_std, noise, *,
                            block_b=4096, cast_inputs_to_bf16=False):
    """Returns (action, log_prob, entropy), matching GaussianPolicyNet.forward.

    Weights are stored as [in_features, out_features], so x @ W == PyTorch x @ W.T.
    On v7x (3.2 TB/s HBM) consider passing block_b=8192..16384.
    """
    B, OBS = x.shape
    H = w1.shape[1]
    A = w2.shape[1]
    C = max(H, A)

    # Pack the tiny per-feature constants into a single [4, C] f32 array
    # (pads to 8x128 in VMEM anyway, so the extra std row is free).
    log_std_f32 = log_std.astype(jnp.float32)
    consts = jnp.zeros((4, C), jnp.float32)
    consts = consts.at[0, :H].set(b1.astype(jnp.float32))
    consts = consts.at[1, :A].set(b2.astype(jnp.float32))
    consts = consts.at[2, :A].set(log_std_f32)
    consts = consts.at[3, :A].set(jnp.exp(log_std_f32))

    if cast_inputs_to_bf16:
        # Halves the dominant HBM stream (x); dots still accumulate in f32.
        x = x.astype(jnp.bfloat16)
        w1 = w1.astype(jnp.bfloat16)
        w2 = w2.astype(jnp.bfloat16)

    x_itemsize = jnp.dtype(x.dtype).itemsize
    w_itemsize = jnp.dtype(w1.dtype).itemsize
    per_row_bytes = OBS * x_itemsize + A * 4 + 2 * A * 4     # x + noise + out per row
    fixed_bytes = 2 * (OBS * H + H * A) * w_itemsize + 4 * C * 4

    TB = _choose_batch_tile(B, per_row_bytes, fixed_bytes, block_b)
    grid = (pl.cdiv(B, TB),)

    in_specs = [
        pl.BlockSpec((TB, OBS), lambda i: (i, 0)),   # x: tiled over batch
        pl.BlockSpec((OBS, H), lambda i: (0, 0)),    # W1: VMEM-resident
        pl.BlockSpec((H, A), lambda i: (0, 0)),      # W2: VMEM-resident
        pl.BlockSpec((4, C), lambda i: (0, 0)),      # packed b1 / b2 / log_std / std
        pl.BlockSpec((TB, A), lambda i: (i, 0)),     # eps: tiled over batch
    ]
    out_specs = pl.BlockSpec((TB, 2 * A), lambda i: (i, 0))

    packed = pl.pallas_call(
        _policy_kernel,
        out_shape=jax.ShapeDtypeStruct((B, 2 * A), jnp.float32),
        grid=grid,
        in_specs=in_specs,
        out_specs=out_specs,
        compiler_params=pltpu.CompilerParams(
            dimension_semantics=("parallel",),
        ),
    )(x, w1, w2, consts, noise)

    action = packed[:, :A]
    log_prob = packed[:, A:]
    # Normal entropy depends only on log_std; computed in the wrapper and broadcast.
    entropy = jnp.broadcast_to(0.5 + _HALF_LOG_2PI + log_std_f32, (B, A))
    return action, log_prob, entropy


def init_params(key, obs_dim, action_dim, hidden=16):
    """Deterministic init mirroring PyTorch nn.Linear defaults (uniform +/- 1/sqrt(fan_in))."""
    k1, k2, k3, k4 = jax.random.split(key, 4)
    bound1 = 1.0 / math.sqrt(obs_dim)
    bound2 = 1.0 / math.sqrt(hidden)
    w1 = jax.random.uniform(k1, (obs_dim, hidden), jnp.float32, -bound1, bound1)
    b1 = jax.random.uniform(k2, (hidden,), jnp.float32, -bound1, bound1)
    w2 = jax.random.uniform(k3, (hidden, action_dim), jnp.float32, -bound2, bound2)
    b2 = jax.random.uniform(k4, (action_dim,), jnp.float32, -bound2, bound2)
    log_std = -0.5 * jnp.ones((action_dim,), jnp.float32)
    return w1, b1, w2, b2, log_std


if __name__ == "__main__":
    key = jax.random.PRNGKey(0)
    k_params, k_x, k_noise = jax.random.split(key, 3)

    B, OBS, ACT = 8, 32, 4   # batch, observation_space_shape, action_dim
    w1, b1, w2, b2, log_std = init_params(k_params, OBS, ACT)
    x = jax.random.normal(k_x, (B, OBS), jnp.float32)
    # eps for action = mean + std * eps (torch.normal(mean, std) semantics)
    noise = jax.random.normal(k_noise, (B, ACT), jnp.float32)

    action, log_prob, entropy = gaussian_policy_forward(
        x, w1, b1, w2, b2, log_std, noise
    )
    jax.block_until_ready((action, log_prob, entropy))

    # Sanity check against a pure-JAX reference using the *unsimplified* Normal formulas.
    h_ref = jnp.tanh(x @ w1 + b1)
    mean_ref = h_ref @ w2 + b2
    std_ref = jnp.exp(log_std)
    act_ref = mean_ref + std_ref * noise
    lp_ref = (-((act_ref - mean_ref) ** 2) / (2 * std_ref**2)
              - log_std - 0.5 * math.log(2 * math.pi))
    ent_ref = jnp.broadcast_to(
        0.5 + 0.5 * math.log(2 * math.pi) + log_std, mean_ref.shape
    )
    assert jnp.allclose(action, act_ref, atol=1e-5)
    assert jnp.allclose(log_prob, lp_ref, atol=1e-5)
    assert jnp.allclose(entropy, ent_ref, atol=1e-5)

    # Exercise the optional bf16-input path (accumulation / outputs stay f32);
    # only a coarse finiteness + shape check since inputs are rounded to bf16.
    a_bf, lp_bf, _ = gaussian_policy_forward(
        x, w1, b1, w2, b2, log_std, noise, cast_inputs_to_bf16=True
    )
    jax.block_until_ready((a_bf, lp_bf))
    assert a_bf.shape == (B, ACT) and lp_bf.shape == (B, ACT)
    assert bool(jnp.all(jnp.isfinite(a_bf))) and bool(jnp.all(jnp.isfinite(lp_bf)))

    print("KERNEL_OK")
</pallas_src>

<mosaic_0001>
module attributes {stable_mosaic.version = 11 : i64} {
  func.func @_policy_kernel(%arg0: i32, %arg1: memref<8x32xf32, #tpu.memory_space<vmem>>, %arg2: memref<32x16xf32, #tpu.memory_space<vmem>>, %arg3: memref<16x4xf32, #tpu.memory_space<vmem>>, %arg4: memref<4x16xf32, #tpu.memory_space<vmem>>, %arg5: memref<8x4xf32, #tpu.memory_space<vmem>>, %arg6: memref<8x8xf32, #tpu.memory_space<vmem>>) attributes {dimension_semantics = [#tpu.dimension_semantics<parallel>], iteration_bounds = array<i64: 1>, scalar_prefetch = 0 : i64, scratch_operands = 0 : i64, tpu.core_type = #tpu.core_type<tc>, window_params = [{transform_indices = @transform_0, window_bounds = array<i64: 8, 32>}, {pipeline_mode = #tpu.pipeline_mode<synchronous>, transform_indices = @transform_1, window_bounds = array<i64: 32, 16>}, {pipeline_mode = #tpu.pipeline_mode<synchronous>, transform_indices = @transform_2, window_bounds = array<i64: 16, 4>}, {pipeline_mode = #tpu.pipeline_mode<synchronous>, transform_indices = @transform_3, window_bounds = array<i64: 4, 16>}, {transform_indices = @transform_4, window_bounds = array<i64: 8, 4>}, {transform_indices = @transform_5, window_bounds = array<i64: 8, 8>}]} {
    %c0 = arith.constant 0 : index
    %c0_0 = arith.constant 0 : index
    %0 = vector.load %arg4[%c0, %c0_0] : memref<4x16xf32, #tpu.memory_space<vmem>>, vector<1x16xf32>
    %c1 = arith.constant 1 : index
    %c0_1 = arith.constant 0 : index
    %1 = vector.load %arg4[%c1, %c0_1] : memref<4x16xf32, #tpu.memory_space<vmem>>, vector<1x4xf32>
    %c2 = arith.constant 2 : index
    %c0_2 = arith.constant 0 : index
    %2 = vector.load %arg4[%c2, %c0_2] : memref<4x16xf32, #tpu.memory_space<vmem>>, vector<1x4xf32>
    %c3 = arith.constant 3 : index
    %c0_3 = arith.constant 0 : index
    %3 = vector.load %arg4[%c3, %c0_3] : memref<4x16xf32, #tpu.memory_space<vmem>>, vector<1x4xf32>
    %c0_4 = arith.constant 0 : index
    %c0_5 = arith.constant 0 : index
    %4 = vector.load %arg1[%c0_4, %c0_5] : memref<8x32xf32, #tpu.memory_space<vmem>>, vector<8x32xf32>
    %c0_6 = arith.constant 0 : index
    %c0_7 = arith.constant 0 : index
    %5 = vector.load %arg2[%c0_6, %c0_7] : memref<32x16xf32, #tpu.memory_space<vmem>>, vector<32x16xf32>
    %cst = arith.constant dense<0.000000e+00> : vector<8x16xf32>
    %6 = tpu.matmul %4, %5, %cst {dimension_numbers = #tpu.dot_dimension_numbers<[1], [0], [0], [1], [0, 0, 1, 1], [], []>} : vector<8x32xf32>, vector<32x16xf32>, vector<8x16xf32> -> vector<8x16xf32>
    %7 = vector.broadcast %0 : vector<1x16xf32> to vector<8x16xf32>
    %8 = arith.addf %6, %7 : vector<8x16xf32>
    %9 = math.tanh %8 : vector<8x16xf32>
    %c0_8 = arith.constant 0 : index
    %c0_9 = arith.constant 0 : index
    %10 = vector.load %arg3[%c0_8, %c0_9] : memref<16x4xf32, #tpu.memory_space<vmem>>, vector<16x4xf32>
    %cst_10 = arith.constant dense<0.000000e+00> : vector<8x4xf32>
    %11 = tpu.matmul %9, %10, %cst_10 {dimension_numbers = #tpu.dot_dimension_numbers<[1], [0], [0], [1], [0, 0, 1, 1], [], []>} : vector<8x16xf32>, vector<16x4xf32>, vector<8x4xf32> -> vector<8x4xf32>
    %12 = vector.broadcast %1 : vector<1x4xf32> to vector<8x4xf32>
    %13 = arith.addf %11, %12 : vector<8x4xf32>
    %c0_11 = arith.constant 0 : index
    %c0_12 = arith.constant 0 : index
    %14 = vector.load %arg5[%c0_11, %c0_12] : memref<8x4xf32, #tpu.memory_space<vmem>>, vector<8x4xf32>
    %15 = vector.broadcast %3 : vector<1x4xf32> to vector<8x4xf32>
    %16 = arith.mulf %15, %14 : vector<8x4xf32>
    %17 = arith.addf %13, %16 : vector<8x4xf32>
    %18 = arith.mulf %14, %14 : vector<8x4xf32>
    %cst_13 = arith.constant -5.000000e-01 : f32
    %19 = vector.broadcast %cst_13 : f32 to vector<8x4xf32>
    %20 = arith.mulf %19, %18 : vector<8x4xf32>
    %21 = vector.broadcast %2 : vector<1x4xf32> to vector<8x4xf32>
    %22 = arith.subf %20, %21 : vector<8x4xf32>
    %cst_14 = arith.constant 0.918938517 : f32
    %23 = vector.broadcast %cst_14 : f32 to vector<8x4xf32>
    %24 = arith.subf %22, %23 : vector<8x4xf32>
    %c0_15 = arith.constant 0 : index
    %c0_16 = arith.constant 0 : index
    %25 = vector.load %arg6[%c0_15, %c0_16] : memref<8x8xf32, #tpu.memory_space<vmem>>, vector<8x4xf32>
    tpu.vector_store %arg6[%c0_15, %c0_16], %17 {strides = array<i32>} : memref<8x8xf32, #tpu.memory_space<vmem>>, vector<8x4xf32>,
    %c0_17 = arith.constant 0 : index
    %c4 = arith.constant 4 : index
    %26 = vector.load %arg6[%c0_17, %c4] : memref<8x8xf32, #tpu.memory_space<vmem>>, vector<8x4xf32>
    tpu.vector_store %arg6[%c0_17, %c4], %24 {strides = array<i32>} : memref<8x8xf32, #tpu.memory_space<vmem>>, vector<8x4xf32>,
    return
  }
  func.func @transform_0(%arg0: i32) -> (i32, i32) {
    %c0_i32 = arith.constant 0 : i32
    %c0_i32_0 = arith.constant 0 : i32
    return %arg0, %c0_i32 : i32, i32
  }
  func.func @transform_1(%arg0: i32) -> (i32, i32) {
    %c0_i32 = arith.constant 0 : i32
    %c0_i32_0 = arith.constant 0 : i32
    %c0_i32_1 = arith.constant 0 : i32
    return %c0_i32, %c0_i32_0 : i32, i32
  }
  func.func @transform_2(%arg0: i32) -> (i32, i32) {
    %c0_i32 = arith.constant 0 : i32
    %c0_i32_0 = arith.constant 0 : i32
    %c0_i32_1 = arith.constant 0 : i32
    return %c0_i32, %c0_i32_0 : i32, i32
  }
  func.func @transform_3(%arg0: i32) -> (i32, i32) {
    %c0_i32 = arith.constant 0 : i32
    %c0_i32_0 = arith.constant 0 : i32
    %c0_i32_1 = arith.constant 0 : i32
    return %c0_i32, %c0_i32_0 : i32, i32
  }
  func.func @transform_4(%arg0: i32) -> (i32, i32) {
    %c0_i32 = arith.constant 0 : i32
    %c0_i32_0 = arith.constant 0 : i32
    return %arg0, %c0_i32 : i32, i32
  }
  func.func @transform_5(%arg0: i32) -> (i32, i32) {
    %c0_i32 = arith.constant 0 : i32
    %c0_i32_0 = arith.constant 0 : i32
    return %arg0, %c0_i32 : i32, i32
  }
}

</mosaic_0001>

<bundles_post_ra>
// kernel: tpu_custom_call.1
= control target key start
LH: loop header
LB: loop body
LE: loop exit
PB: predicated region body
PF: predicated region fallthrough
CT: control target
= control target key end

     0   :  { %v299_v3 = vmov 0.0|0.0   ;;  %vm300_vm0 = vmmov 0   ;;  %v301_v6 = vmov 0.0   ;;  %s382_s0 = inlined_call_operand.vmem [shape: f32[8,32], index: 0, kind: input, shape index: {}]   ;;  %s383_s1 = inlined_call_operand.vmem [shape: f32[32,16], index: 1, kind: input, shape index: {}]   ;;  %s384_s2 = inlined_call_operand.vmem [shape: f32[16,4], index: 2, kind: input, shape index: {}]   ;;  %s385_s3 = inlined_call_operand.vmem [shape: f32[4,16], index: 3, kind: input, shape index: {}]   ;;  %s386_s4 = inlined_call_operand.vmem [shape: f32[8,4], index: 4, kind: input, shape index: {}]   ;;  %s387_s5 = inlined_call_operand.hbm [shape: f32[8,8], index: 5, kind: output, shape index: {}]  }
   0x1   :  { %v26_v0 = vld [vmem:[%s383_s1] sm:$0xff]  ;;  %v27_v1 = vld [vmem:[%s383_s1 + $0x8] sm:$0xff]  ;;  %v28_v2 = vld [vmem:[%s383_s1 + $0x10] sm:$0xff]  ;;  %259 = vmatprep.subr.bf16.mxu0 %v299_v3  ;;  %249 = vmatprep.mubr.msk.f32.mxu0 %vm300_vm0, %v301_v6 }
   0x2   :  { %v260_v4 = vpack.c.bf16 %v27_v1, %v26_v0  ;;  %v29_v5 = vld [vmem:[%s383_s1 + $0x18] sm:$0xff]  ;;  %265 = vmatprep.subr.bf16.mxu1 %v299_v3  ;;  %256 = vmatprep.mubr.msk.f32.mxu1 %vm300_vm0, %v301_v6 }
   0x3   :  { %10 = vsyncpa [#allocation3], 0  ;;  %v263_v7 = vpack.c.bf16 %v29_v5, %v28_v2  ;;  %v25_v8 = vld [vmem:[%s382_s0] sm:$0xff]  ;;  %vm34_vm1 = vcmask 261120   ;;  %v110_v10 = vld [vmem:[%s384_s2 + $0x8] sm:$0xff]  ;;  %s302_s0 = smov 4  }
   0x4   :  { %261 = vmatpush3.bf16.msra.mxu0 %v260_v4  ;;  %v109_v9 = vld [vmem:[%s384_s2] sm:$0xff]  ;;  %vm115_vm2 = vcmask 130048   ;;  %s303_s14 = smov [#allocation2]   ;;  %vm204_vm3 = vcmask 31744   ;;  %vm210_vm4 = vcmask 64544  }
   0x5   :  { %262 = vmatprep.subr.bf16.mxu0 %v299_v3  ;;  %v266_v11 = vpack.c.bf16 %v110_v10, %v109_v9  ;;  %v189_v12 = vld [vmem:[%s386_s4] sm:$0xff]  ;;  %s218_s15 = sshll.u32 %s303_s14, 4  ;;  %s219_s15 = int_to_ptr.vmem [resolvable:$true] %s218_s15 }
   0x6   :  { %v196_v13 = vmul.f32 %v189_v12, %v189_v12  ;;  %v231_v14 = vld [vmem:[%s385_s3 + $0x2] ss:$0 sm:$0xff]  ;;  %v226_v18 = vld [vmem:[%s385_s3] ss:$0 sm:$0xff]  ;;  %v230_v23 = vld [vmem:[%s385_s3 + $0x3] ss:$0 sm:$0xff]  ;;  %p280_p1 = scmp.lt.s32.totalorder %s219_s15, %s219_s15 }
   0x7   :  { %267 = vmatpush3.bf16.msra.mxu1 %v266_v11  ;;  %v228_v24 = vld [vmem:[%s385_s3 + $0x1] ss:$0 sm:$0xff]  ;;  %v194_v25 = vmul.f32 %v230_v23, %v189_v12  ;;  %s275_s16 = scalar_lea.vmem %s219_s15, 128 }
   0x8   :  { %264 = vmatpush3.bf16.msra.mxu0 %v263_v7  ;;  %v197_v15 = vmul.f32 -0.5, %v196_v13  ;;  %p276_p0 = scmp.ne.s32.totalorder %s219_s15, %s275_s16  ;;  %p281_p2 = scmp.lt.s32.totalorder %s275_s16, %s275_s16 }
   0xa   :  { %v202_v16 = vsub.f32 %v197_v15, %v231_v14  ;;  %p282_p3 = por %p281_p2, %p280_p1 }
   0xb   :  { %250 = vmatmul.mubr.msk.f32.vlgmr.msra.gmra.mrb[0].mxu0 %vm34_vm1, %v25_v8 }
   0xc   :  { %v232_v17 = vadd.f32 -0.9189385, %v202_v16  ;;  %p283_p4 = pnand %p282_p3, %p276_p0 }
   0xe   :  { %207 = vrot.lane.b32.xlu0 %v232_v17, %s302_s0 }
  0x80   :  { %v208_v30 = vpop.permute.xlu0 %207 }
  0xde   :  { %v104_v19 = vpop.f32.mrb[0].mxu0 }
  0xdf   :  { %v105_v20 = vadd.f32 %v226_v18, %v104_v19  ;;  %v251_v21 = vpop.f32.mrb[1].mxu0 }
  0xe1   :  { %273 = vtanh.f32 %v105_v20 }
  0xeb   :  { %v274_v22 = vpop.eup %273 }
  0xec   :  { %257 = vmatmul.mubr.msk.f32.vlgmr.msra.gmra.mrb[0].mxu1 %vm115_vm2, %v274_v22 }
 0x1bf   :  { %v185_v26 = vpop.f32.mrb[0].mxu1 }
 0x1c0   :  { %v186_v27 = vadd.f32 %v228_v24, %v185_v26  ;;  %v258_v28 = vpop.f32.mrb[1].mxu1 }
 0x1c2   :  { %v195_v29 = vadd.f32 %v194_v25, %v186_v27 }
 0x1c4   :  { %205 = vst.msk [vmem:[#allocation2] sm:$0xff] %vm204_vm3, %v195_v29 }
 0x1c5   :  { %211 = vst.msk [vmem:[#allocation2] sm:$0xff] %vm210_vm4, %v208_v30 }
 0x1c6   :  { %286 = shalt.err (!%p283_p4)
}
 0x1c7   :  { %s287_s18 = scalar_lea.hbm %s387_s5, 128 }
 0x1c8   :  { %p288_p5 = scmp.ne.s32.totalorder %s387_s5, %s287_s18  ;;  %p291_p6 = scmp.lt.u32.totalorder %s287_s18, %s387_s5 }
 0x1ca   :  { %p293_p7 = pnand %p291_p6, %p288_p5 }
 0x1cc   :  { %296 = shalt.err (!%p293_p7)
}
 0x1cd   :  { %221 = dma.vmem_to_hbm [thread:$0]  %s219_s15, 128, %s387_s5, [#allocation3]  }
 0x1ce   :  { %297 = dma.done.wait [#allocation3], 128  }
 0x1cf   :  { %298 = vsyncadd [#allocation3], 4294967168 }
 0x1d0   :  { %225 = vsyncpa [#allocation3], 1 }

</bundles_post_ra>
